<compile_context>
chip_gen: v6e
topology: v6e:2x2x1
jax: 0.10.0
libtpu: 0.0.40
codegen_flags: <defaults>
</compile_context>

<pallas_src>
import math
import functools

import jax
import jax.numpy as jnp
from jax.experimental import pallas as pl
from jax.experimental.pallas import tpu as pltpu


# ----------------------------------------------------------------------------
# Pallas kernel: KP_Decoder.forward for one batch row (grid runs over batch)
# ----------------------------------------------------------------------------
def kp_decoder_kernel(qin_ref, k_ref, v_ref, shk_ref, mask_ref, wq_ref, mhc_ref,
                      probs_ref, *, N, inv_sqrt_d, inv_sqrt_embedding_dim,
                      logit_clipping):
    G, E1 = qin_ref.shape                       # (group, embedding+1)
    H, T, D = k_ref.shape                       # (heads, nodes+sols, qkv_dim)
    HD = H * D

    qin = qin_ref[...]                          # (G, E1)  [graph | capacity]
    mask_cat = mask_ref[...]                    # (G, T)   [ninf_mask | sols_mask]

    # --- q projection, all heads at once.  Leading-batch einsum over heads:
    #     same FLOPs as one (G,E1)@(E1,HD) matmul but lands head-major with no
    #     relayout of the matmul output.
    qin_b = jnp.broadcast_to(qin[None, :, :], (H, G, E1))
    qh = jnp.einsum('hge,hde->hgd', qin_b, wq_ref[...],
                    preferred_element_type=jnp.float32)        # (H, G, D)

    # --- fused node+solution multi-head attention against concatenated K/V.
    #     K/V are bf16 in HBM (half the DMA bytes); the upcast to f32 is exact
    #     and keeps the MXU math f32 so the 1e-5 check vs the f32 reference
    #     holds (bf16 MXU feed deliberately not used - review correctness note).
    k = k_ref[...].astype(jnp.float32)                          # (H, T, D)
    v = v_ref[...].astype(jnp.float32)                          # (H, T, D)

    sc = jnp.einsum('hgd,htd->hgt', qh, k,
                    preferred_element_type=jnp.float32)         # (H, G, T)
    sc = sc * inv_sqrt_d + mask_cat[None, :, :]

    # Segmented softmax: node columns [0,N) and solution columns [N,T) each get
    # their own max/denominator (mathematically identical to two softmaxes +
    # concat, with no lane slicing / concat).
    # NOTE: a fully -inf-masked segment yields NaN (same as the reference);
    # the caller guarantees at least one feasible entry per segment.
    col = jax.lax.broadcasted_iota(jnp.int32, sc.shape, 2)
    is_node = col < N
    neg_inf = jnp.float32(-jnp.inf)
    m_n = jnp.max(jnp.where(is_node, sc, neg_inf), axis=-1, keepdims=True)
    m_s = jnp.max(jnp.where(is_node, neg_inf, sc), axis=-1, keepdims=True)
    e = jnp.exp(sc - jnp.where(is_node, m_n, m_s))
    d_n = jnp.sum(jnp.where(is_node, e, 0.0), axis=-1, keepdims=True)
    d_s = jnp.sum(jnp.where(is_node, 0.0, e), axis=-1, keepdims=True)
    p = e / jnp.where(is_node, d_n, d_s)                        # (H, G, T)

    # One value matmul over the concatenated [V ; V_s]:
    #   p_n @ V + p_s @ V_s  ==  [p_n | p_s] @ [V ; V_s]   (exact)
    o = jnp.einsum('hgt,htd->hgd', p, v,
                   preferred_element_type=jnp.float32)          # (H, G, D)

    # --- multi_head_combine: per-head (G,D)@(D,HD) partials summed over heads
    #     (== one (G,HD)@(HD,HD) matmul; avoids the (H,G,D)->(G,HD) relayout).
    mh = jnp.sum(jnp.einsum('hgd,hde->hge', o, mhc_ref[...],
                            preferred_element_type=jnp.float32),
                 axis=0)                                        # (G, HD)

    # --- single-head scoring, clipping, masked softmax over the N nodes.
    score = jnp.dot(mh, shk_ref[...],
                    preferred_element_type=jnp.float32)         # (G, N)
    logits = logit_clipping * jnp.tanh(score * inv_sqrt_embedding_dim)
    logits = logits + mask_cat[:, :N]                           # node mask slice
    mmax = jnp.max(logits, axis=-1, keepdims=True)
    ee = jnp.exp(logits - mmax)
    probs_ref[...] = ee / jnp.sum(ee, axis=-1, keepdims=True)   # (G, N)


def kp_decoder_forward(encoded_graph, capacity, k, v, k_s, v_s, single_head_key,
                       ninf_mask, sols_mask_pomo, Wq_para, mhc_para,
                       *, sqrt_embedding_dim, logit_clipping):
    B, G = capacity.shape
    _, H, N, D = k.shape
    S = k_s.shape[2]
    E = encoded_graph.shape[2]
    HD = H * D
    T = N + S
    E1 = E + 1
    # multi_head_combine consumes the H*D concat dim as the embedding dim; the
    # model is only well-defined when they coincide.
    assert E == HD, "KP_Decoder requires embedding_dim == head_num * qkv_dim"

    # q input = [broadcast(graph) | capacity]  (one row per (batch, group)).
    graph_b = jnp.broadcast_to(encoded_graph.astype(jnp.float32), (B, G, E))
    qin = jnp.concatenate(
        [graph_b, capacity.astype(jnp.float32)[:, :, None]], axis=2)   # (B,G,E1)

    # Concatenated node+solution K/V (bf16 halves HBM->VMEM DMA bytes).
    kcat = jnp.concatenate([k, k_s], axis=2).astype(jnp.bfloat16)       # (B,H,T,D)
    vcat = jnp.concatenate([v, v_s], axis=2).astype(jnp.bfloat16)       # (B,H,T,D)
    mask_cat = jnp.concatenate(
        [ninf_mask, sols_mask_pomo], axis=2).astype(jnp.float32)        # (B,G,T)
    shk = single_head_key.astype(jnp.float32)                           # (B,E,N)

    # Head-major weight slabs (pure state prep, outside the kernel).
    wq_h = Wq_para.astype(jnp.float32).reshape(H, D, E1)                # (H,D,E1)
    mhc_r = jnp.transpose(mhc_para).astype(jnp.float32).reshape(H, D, E)  # (H,D,E)

    kernel = functools.partial(
        kp_decoder_kernel, N=N,
        inv_sqrt_d=1.0 / math.sqrt(D),
        inv_sqrt_embedding_dim=1.0 / float(sqrt_embedding_dim),
        logit_clipping=float(logit_clipping))

    # One batch row per grid step; the "parallel" axis lets v7x shard the grid
    # across its 2 TensorCores.  Per-row working set is KB-scale, so this also
    # fits v7x's 64 MiB VMEM with plenty of headroom (limit set explicitly).
    # For production shapes, raise the leading block dim to a few-MiB chunk.
    probs = pl.pallas_call(
        kernel,
        out_shape=jax.ShapeDtypeStruct((B, G, N), jnp.float32),
        grid=(B,),
        in_specs=[
            pl.BlockSpec((None, G, E1), lambda i: (i, 0, 0)),       # [graph|cap]
            pl.BlockSpec((None, H, T, D), lambda i: (i, 0, 0, 0)),  # K_cat (bf16)
            pl.BlockSpec((None, H, T, D), lambda i: (i, 0, 0, 0)),  # V_cat (bf16)
            pl.BlockSpec((None, E, N), lambda i: (i, 0, 0)),        # single_head_key
            pl.BlockSpec((None, G, T), lambda i: (i, 0, 0)),        # [ninf|sols] mask
            pl.BlockSpec((H, D, E1), lambda i: (0, 0, 0)),          # Wq (head-major)
            pl.BlockSpec((H, D, E), lambda i: (0, 0, 0)),           # combine (head-major)
        ],
        out_specs=pl.BlockSpec((None, G, N), lambda i: (i, 0, 0)),
        compiler_params=pltpu.CompilerParams(
            dimension_semantics=("parallel",),
            vmem_limit_bytes=32 * 1024 * 1024),
    )(qin, kcat, vcat, shk, mask_cat, wq_h, mhc_r)
    return probs


# ----------------------------------------------------------------------------
# Plain-JAX glue: hyper-network `assign`, `set_kv` (parameter / state setup)
# ----------------------------------------------------------------------------
def reshape_by_heads_jnp(x, H):
    B, n, hd = x.shape
    return x.reshape(B, n, H, hd // H).transpose(0, 2, 1, 3)


def init_params(key, E, H, D, hyper_hidden, embd_dim):
    HD = H * D

    def nrm(k, shape, scale=0.1):
        return scale * jax.random.normal(k, shape, jnp.float32)

    ks = jax.random.split(key, 12)
    return dict(
        fc1_w=nrm(ks[0], (hyper_hidden, embd_dim)), fc1_b=nrm(ks[1], (hyper_hidden,)),
        fc2_w=nrm(ks[2], (hyper_hidden, hyper_hidden)), fc2_b=nrm(ks[3], (hyper_hidden,)),
        fc3_w=nrm(ks[4], (6 * embd_dim, hyper_hidden)), fc3_b=nrm(ks[5], (6 * embd_dim,)),
        hWq=nrm(ks[6], ((1 + E) * HD, embd_dim)),
        hWk=nrm(ks[7], (E * HD, embd_dim)),
        hWv=nrm(ks[8], (E * HD, embd_dim)),
        hMHC=nrm(ks[9], (HD * E, embd_dim)),
        hWk_s=nrm(ks[10], (E * HD, embd_dim)),
        hWv_s=nrm(ks[11], (E * HD, embd_dim)),
    )


def assign(params, pref, E, H, D, embd_dim):
    HD = H * D
    lin = lambda x, w, b: x @ w.T + b
    h1 = lin(pref, params['fc1_w'], params['fc1_b'])
    h2 = lin(h1, params['fc2_w'], params['fc2_b'])
    mid = lin(h2, params['fc3_w'], params['fc3_b'])      # (6 * embd_dim,)
    Wq_para = (params['hWq'] @ mid[:embd_dim]).reshape(HD, 1 + E)
    Wk_para = (params['hWk'] @ mid[embd_dim:2 * embd_dim]).reshape(HD, E)
    Wv_para = (params['hWv'] @ mid[2 * embd_dim:3 * embd_dim]).reshape(HD, E)
    mhc_para = (params['hMHC'] @ mid[3 * embd_dim:4 * embd_dim]).reshape(HD, E)
    Wk_para_s = (params['hWk_s'] @ mid[4 * embd_dim:5 * embd_dim]).reshape(E, HD)
    Wv_para_s = (params['hWv_s'] @ mid[5 * embd_dim:6 * embd_dim]).reshape(E, HD)
    return Wq_para, Wk_para, Wv_para, mhc_para, Wk_para_s, Wv_para_s


def set_kv(encoded_nodes, node_size, Wk_para, Wv_para, Wk_para_s, Wv_para_s, H):
    nodes = encoded_nodes[:, :node_size]
    sols = encoded_nodes[:, node_size:]
    # K/V stored bf16 (halves DMA bytes; kernel upcasts to f32 for all math).
    k = reshape_by_heads_jnp(nodes @ Wk_para.T, H).astype(jnp.bfloat16)
    v = reshape_by_heads_jnp(nodes @ Wv_para.T, H).astype(jnp.bfloat16)
    k_s = reshape_by_heads_jnp(sols @ Wk_para_s.T, H).astype(jnp.bfloat16)
    v_s = reshape_by_heads_jnp(sols @ Wv_para_s.T, H).astype(jnp.bfloat16)
    single_head_key = nodes.transpose(0, 2, 1)
    return k, v, k_s, v_s, single_head_key


# ----------------------------------------------------------------------------
# Pure-JAX f32 reference of KP_Decoder.forward (for correctness check)
# ----------------------------------------------------------------------------
def decoder_ref(graph, capacity, k, v, k_s, v_s, shk, nmask, smask, Wq_para, mhc_para,
                sqrt_embedding_dim, logit_clipping):
    HIGH = jax.lax.Precision.HIGHEST   # force true-f32 matmuls in the reference
    B, G = capacity.shape
    E = graph.shape[2]
    H, D = k.shape[1], k.shape[3]
    input1 = jnp.broadcast_to(graph, (B, G, E))
    input_cat = jnp.concatenate([input1, capacity[:, :, None]], axis=2)
    q_flat = jnp.einsum('bge,oe->bgo', input_cat, Wq_para, precision=HIGH)
    q = reshape_by_heads_jnp(q_flat, H)                  # (B, H, G, D)

    def mha(qq, kk, vv, mask):
        kk = kk.astype(jnp.float32)
        vv = vv.astype(jnp.float32)
        sc = jnp.einsum('bhgd,bhnd->bhgn', qq, kk,
                        precision=HIGH) / jnp.sqrt(jnp.float32(D))
        sc = sc + mask[:, None, :, :]
        w = jax.nn.softmax(sc, axis=3)
        o = jnp.einsum('bhgn,bhnd->bhgd', w, vv, precision=HIGH)
        return o.transpose(0, 2, 1, 3).reshape(B, G, H * D)

    oc = mha(q, k, v, nmask) + mha(q, k_s, v_s, smask)
    mh = jnp.einsum('bgi,oi->bgo', oc, mhc_para, precision=HIGH)
    score = jnp.einsum('bge,ben->bgn', mh, shk.astype(jnp.float32), precision=HIGH)
    score_clipped = logit_clipping * jnp.tanh(score / sqrt_embedding_dim)
    return jax.nn.softmax(score_clipped + nmask, axis=2)


# ----------------------------------------------------------------------------
if __name__ == "__main__":
    key = jax.random.PRNGKey(0)

    # model_params (small)
    E, H, D = 32, 4, 8                    # embedding_dim, head_num, qkv_dim
    hyper_hidden = 16
    embd_dim = 2 + 2                      # decoder hyper embd_dim
    node_size, sols_size = 8, 4
    B, G = 2, 8                           # batch_size, pomo/group size
    sqrt_embedding_dim = math.sqrt(E)
    logit_clipping = 10.0

    k_param, k_pref, k_nodes, k_cap, k_m1, k_m2 = jax.random.split(key, 6)

    params = init_params(k_param, E, H, D, hyper_hidden, embd_dim)
    pref = jax.random.uniform(k_pref, (2 + 2,), jnp.float32)   # hyper_input_dim = 2 + 2

    # pre_forward state.
    # TODO(synk): KP_Encoder (pre_forward) is a separate setup method; encoded_nodes
    # are supplied here as deterministic synthetic embeddings instead of running
    # the full encoder stack.
    encoded_nodes = 0.5 * jax.random.normal(
        k_nodes, (B, node_size + sols_size, E), jnp.float32)
    encoded_graph = jnp.mean(encoded_nodes, axis=1, keepdims=True)   # (B, 1, E)

    (Wq_para, Wk_para, Wv_para, mhc_para,
     Wk_para_s, Wv_para_s) = assign(params, pref, E, H, D, embd_dim)
    kk, vv, kk_s, vv_s, shk = set_kv(
        encoded_nodes, node_size, Wk_para, Wv_para, Wk_para_s, Wv_para_s, H)

    # state inputs for forward()
    capacity = 5.0 + 5.0 * jax.random.uniform(k_cap, (B, G), jnp.float32)
    ninf_mask = jnp.where(jax.random.uniform(k_m1, (B, G, node_size)) < 0.3,
                          -jnp.inf, 0.0).astype(jnp.float32)
    ninf_mask = ninf_mask.at[:, :, 0].set(0.0)       # keep at least one node feasible
    sols_mask_pomo = jnp.where(jax.random.uniform(k_m2, (B, G, sols_size)) < 0.3,
                               -jnp.inf, 0.0).astype(jnp.float32)
    sols_mask_pomo = sols_mask_pomo.at[:, :, 0].set(0.0)

    # KPModel.forward -> decoder probs (Pallas kernel)
    probs = kp_decoder_forward(encoded_graph, capacity, kk, vv, kk_s, vv_s, shk,
                               ninf_mask, sols_mask_pomo, Wq_para, mhc_para,
                               sqrt_embedding_dim=sqrt_embedding_dim,
                               logit_clipping=logit_clipping)
    probs = jax.block_until_ready(probs)

    # eval branch (eval_type='argmax', eval mode): selected = argmax, prob = None.
    # TODO(synk): the training / 'softmax' branch uses torch.multinomial sampling
    # (PyTorch RNG) and is not reproduced; the deterministic argmax branch is used.
    selected = jax.block_until_ready(jnp.argmax(probs, axis=2))
    prob = None

    # correctness check against pure-JAX f32 reference (same bf16 K/V state)
    ref = decoder_ref(encoded_graph, capacity, kk, vv, kk_s, vv_s, shk,
                      ninf_mask, sols_mask_pomo, Wq_para, mhc_para,
                      sqrt_embedding_dim, logit_clipping)
    ref = jax.block_until_ready(ref)
    assert probs.shape == (B, G, node_size)
    assert selected.shape == (B, G)
    assert bool(jnp.allclose(probs, ref, atol=1e-5, rtol=1e-5))
    print("KERNEL_OK")
</pallas_src>

<mosaic_0001>
module attributes {stable_mosaic.version = 11 : i64} {
  func.func @kp_decoder_kernel(%arg0: i32, %arg1: memref<1x8x33xf32, #tpu.memory_space<vmem>>, %arg2: memref<1x4x12x8xbf16, #tpu.memory_space<vmem>>, %arg3: memref<1x4x12x8xbf16, #tpu.memory_space<vmem>>, %arg4: memref<1x32x8xf32, #tpu.memory_space<vmem>>, %arg5: memref<1x8x12xf32, #tpu.memory_space<vmem>>, %arg6: memref<4x8x33xf32, #tpu.memory_space<vmem>>, %arg7: memref<4x8x32xf32, #tpu.memory_space<vmem>>, %arg8: memref<1x8x8xf32, #tpu.memory_space<vmem>>) attributes {dimension_semantics = [#tpu.dimension_semantics<parallel>], iteration_bounds = array<i64: 2>, scalar_prefetch = 0 : i64, scratch_operands = 0 : i64, tpu.core_type = #tpu.core_type<tc>, window_params = [{transform_indices = @transform_0, window_bounds = array<i64: 1, 8, 33>}, {transform_indices = @transform_1, window_bounds = array<i64: 1, 4, 12, 8>}, {transform_indices = @transform_2, window_bounds = array<i64: 1, 4, 12, 8>}, {transform_indices = @transform_3, window_bounds = array<i64: 1, 32, 8>}, {transform_indices = @transform_4, window_bounds = array<i64: 1, 8, 12>}, {pipeline_mode = #tpu.pipeline_mode<synchronous>, transform_indices = @transform_5, window_bounds = array<i64: 4, 8, 33>}, {pipeline_mode = #tpu.pipeline_mode<synchronous>, transform_indices = @transform_6, window_bounds = array<i64: 4, 8, 32>}, {transform_indices = @transform_7, window_bounds = array<i64: 1, 8, 8>}]} {
    %c0 = arith.constant 0 : index
    %c0_0 = arith.constant 0 : index
    %c0_1 = arith.constant 0 : index
    %0 = vector.load %arg1[%c0, %c0_0, %c0_1] : memref<1x8x33xf32, #tpu.memory_space<vmem>>, vector<1x8x33xf32>
    %1 = vector.shape_cast %0 : vector<1x8x33xf32> to vector<8x33xf32>
    %c0_2 = arith.constant 0 : index
    %c0_3 = arith.constant 0 : index
    %c0_4 = arith.constant 0 : index
    %2 = vector.load %arg5[%c0_2, %c0_3, %c0_4] : memref<1x8x12xf32, #tpu.memory_space<vmem>>, vector<1x8x12xf32>
    %3 = vector.shape_cast %2 : vector<1x8x12xf32> to vector<8x12xf32>
    %4 = vector.shape_cast %1 : vector<8x33xf32> to vector<1x8x33xf32>
    %5 = vector.shape_cast %4 : vector<1x8x33xf32> to vector<1x8x33xf32>
    %6 = vector.broadcast %5 : vector<1x8x33xf32> to vector<4x8x33xf32>
    %c0_5 = arith.constant 0 : index
    %c0_6 = arith.constant 0 : index
    %c0_7 = arith.constant 0 : index
    %7 = vector.load %arg6[%c0_5, %c0_6, %c0_7] : memref<4x8x33xf32, #tpu.memory_space<vmem>>, vector<4x8x33xf32>
    "tpu.trace_start"() <{level = 10 : i32, message = "hge,hde->hgd"}> : () -> ()
    %cst = arith.constant dense<0.000000e+00> : vector<4x8x8xf32>
    %8 = tpu.matmul %6, %7, %cst {dimension_numbers = #tpu.dot_dimension_numbers<[2], [2], [1], [1], [0, 0, 0, 1, 1, 1], [0], [0]>} : vector<4x8x33xf32>, vector<4x8x33xf32>, vector<4x8x8xf32> -> vector<4x8x8xf32>
    "tpu.trace_stop"() : () -> ()
    %c0_8 = arith.constant 0 : index
    %c0_9 = arith.constant 0 : index
    %c0_10 = arith.constant 0 : index
    %c0_11 = arith.constant 0 : index
    %9 = vector.load %arg2[%c0_8, %c0_9, %c0_10, %c0_11] : memref<1x4x12x8xbf16, #tpu.memory_space<vmem>>, vector<1x4x12x8xbf16>
    %10 = vector.shape_cast %9 : vector<1x4x12x8xbf16> to vector<4x12x8xbf16>
    %11 = arith.extf %10 : vector<4x12x8xbf16> to vector<4x12x8xf32>
    %c0_12 = arith.constant 0 : index
    %c0_13 = arith.constant 0 : index
    %c0_14 = arith.constant 0 : index
    %c0_15 = arith.constant 0 : index
    %12 = vector.load %arg3[%c0_12, %c0_13, %c0_14, %c0_15] : memref<1x4x12x8xbf16, #tpu.memory_space<vmem>>, vector<1x4x12x8xbf16>
    %13 = vector.shape_cast %12 : vector<1x4x12x8xbf16> to vector<4x12x8xbf16>
    %14 = arith.extf %13 : vector<4x12x8xbf16> to vector<4x12x8xf32>
    "tpu.trace_start"() <{level = 10 : i32, message = "hgd,htd->hgt"}> : () -> ()
    %cst_16 = arith.constant dense<0.000000e+00> : vector<4x8x12xf32>
    %15 = tpu.matmul %8, %11, %cst_16 {dimension_numbers = #tpu.dot_dimension_numbers<[2], [2], [1], [1], [0, 0, 0, 1, 1, 1], [0], [0]>} : vector<4x8x8xf32>, vector<4x12x8xf32>, vector<4x8x12xf32> -> vector<4x8x12xf32>
    "tpu.trace_stop"() : () -> ()
    %cst_17 = arith.constant 0.353553385 : f32
    %16 = vector.broadcast %cst_17 : f32 to vector<4x8x12xf32>
    %17 = arith.mulf %15, %16 : vector<4x8x12xf32>
    %18 = vector.shape_cast %3 : vector<8x12xf32> to vector<1x8x12xf32>
    %19 = vector.broadcast %18 : vector<1x8x12xf32> to vector<4x8x12xf32>
    %20 = arith.addf %17, %19 : vector<4x8x12xf32>
    %21 = tpu.iota {dimensions = array<i32: 2>} : vector<4x8x12xi32>
    %c8_i32 = arith.constant 8 : i32
    %22 = vector.broadcast %c8_i32 : i32 to vector<4x8x12xi32>
    %23 = arith.cmpi slt, %21, %22 : vector<4x8x12xi32>
    %cst_18 = arith.constant 0xFF800000 : f32
    %24 = vector.broadcast %cst_18 : f32 to vector<4x8x12xf32>
    %25 = arith.select %23, %20, %24 : vector<4x8x12xi1>, vector<4x8x12xf32>
    %cst_19 = arith.constant dense<0xFF800000> : vector<4x8xf32>
    %26 = vector.multi_reduction <maximumf>, %25, %cst_19 [2] : vector<4x8x12xf32> to vector<4x8xf32>
    %27 = vector.shape_cast %26 : vector<4x8xf32> to vector<4x8x1xf32>
    %cst_20 = arith.constant 0xFF800000 : f32
    %28 = vector.broadcast %cst_20 : f32 to vector<4x8x12xf32>
    %29 = arith.select %23, %28, %20 : vector<4x8x12xi1>, vector<4x8x12xf32>
    %cst_21 = arith.constant dense<0xFF800000> : vector<4x8xf32>
    %30 = vector.multi_reduction <maximumf>, %29, %cst_21 [2] : vector<4x8x12xf32> to vector<4x8xf32>
    %31 = vector.shape_cast %30 : vector<4x8xf32> to vector<4x8x1xf32>
    %32 = vector.shape_cast %27 : vector<4x8x1xf32> to vector<4x8x1xf32>
    %33 = vector.broadcast %32 : vector<4x8x1xf32> to vector<4x8x12xf32>
    %34 = vector.shape_cast %31 : vector<4x8x1xf32> to vector<4x8x1xf32>
    %35 = vector.broadcast %34 : vector<4x8x1xf32> to vector<4x8x12xf32>
    %36 = arith.select %23, %33, %35 : vector<4x8x12xi1>, vector<4x8x12xf32>
    %37 = arith.subf %20, %36 : vector<4x8x12xf32>
    %38 = math.exp %37 : vector<4x8x12xf32>
    %cst_22 = arith.constant 0.000000e+00 : f32
    %39 = vector.broadcast %cst_22 : f32 to vector<4x8x12xf32>
    %40 = arith.select %23, %38, %39 : vector<4x8x12xi1>, vector<4x8x12xf32>
    %cst_23 = arith.constant dense<0.000000e+00> : vector<4x8xf32>
    %41 = vector.multi_reduction <add>, %40, %cst_23 [2] : vector<4x8x12xf32> to vector<4x8xf32>
    %42 = vector.shape_cast %41 : vector<4x8xf32> to vector<4x8x1xf32>
    %cst_24 = arith.constant 0.000000e+00 : f32
    %43 = vector.broadcast %cst_24 : f32 to vector<4x8x12xf32>
    %44 = arith.select %23, %43, %38 : vector<4x8x12xi1>, vector<4x8x12xf32>
    %cst_25 = arith.constant dense<0.000000e+00> : vector<4x8xf32>
    %45 = vector.multi_reduction <add>, %44, %cst_25 [2] : vector<4x8x12xf32> to vector<4x8xf32>
    %46 = vector.shape_cast %45 : vector<4x8xf32> to vector<4x8x1xf32>
    %47 = vector.shape_cast %42 : vector<4x8x1xf32> to vector<4x8x1xf32>
    %48 = vector.broadcast %47 : vector<4x8x1xf32> to vector<4x8x12xf32>
    %49 = vector.shape_cast %46 : vector<4x8x1xf32> to vector<4x8x1xf32>
    %50 = vector.broadcast %49 : vector<4x8x1xf32> to vector<4x8x12xf32>
    %51 = arith.select %23, %48, %50 : vector<4x8x12xi1>, vector<4x8x12xf32>
    %52 = arith.divf %38, %51 : vector<4x8x12xf32>
    "tpu.trace_start"() <{level = 10 : i32, message = "hgt,htd->hgd"}> : () -> ()
    %cst_26 = arith.constant dense<0.000000e+00> : vector<4x8x8xf32>
    %53 = tpu.matmul %52, %14, %cst_26 {dimension_numbers = #tpu.dot_dimension_numbers<[2], [1], [1], [2], [0, 0, 0, 1, 1, 2], [0], [0]>} : vector<4x8x12xf32>, vector<4x12x8xf32>, vector<4x8x8xf32> -> vector<4x8x8xf32>
    "tpu.trace_stop"() : () -> ()
    %c0_27 = arith.constant 0 : index
    %c0_28 = arith.constant 0 : index
    %c0_29 = arith.constant 0 : index
    %54 = vector.load %arg7[%c0_27, %c0_28, %c0_29] : memref<4x8x32xf32, #tpu.memory_space<vmem>>, vector<4x8x32xf32>
    "tpu.trace_start"() <{level = 10 : i32, message = "hgd,hde->hge"}> : () -> ()
    %cst_30 = arith.constant dense<0.000000e+00> : vector<4x8x32xf32>
    %55 = tpu.matmul %53, %54, %cst_30 {dimension_numbers = #tpu.dot_dimension_numbers<[2], [1], [1], [2], [0, 0, 0, 1, 1, 2], [0], [0]>} : vector<4x8x8xf32>, vector<4x8x32xf32>, vector<4x8x32xf32> -> vector<4x8x32xf32>
    "tpu.trace_stop"() : () -> ()
    %cst_31 = arith.constant dense<0.000000e+00> : vector<8x32xf32>
    %56 = vector.multi_reduction <add>, %55, %cst_31 [0] : vector<4x8x32xf32> to vector<8x32xf32>
    %c0_32 = arith.constant 0 : index
    %c0_33 = arith.constant 0 : index
    %c0_34 = arith.constant 0 : index
    %57 = vector.load %arg4[%c0_32, %c0_33, %c0_34] : memref<1x32x8xf32, #tpu.memory_space<vmem>>, vector<1x32x8xf32>
    %58 = vector.shape_cast %57 : vector<1x32x8xf32> to vector<32x8xf32>
    %cst_35 = arith.constant dense<0.000000e+00> : vector<8x8xf32>
    %59 = tpu.matmul %56, %58, %cst_35 {dimension_numbers = #tpu.dot_dimension_numbers<[1], [0], [0], [1], [0, 0, 1, 1], [], []>} : vector<8x32xf32>, vector<32x8xf32>, vector<8x8xf32> -> vector<8x8xf32>
    %cst_36 = arith.constant 0.176776692 : f32
    %60 = vector.broadcast %cst_36 : f32 to vector<8x8xf32>
    %61 = arith.mulf %59, %60 : vector<8x8xf32>
    %62 = math.tanh %61 : vector<8x8xf32>
    %cst_37 = arith.constant 1.000000e+01 : f32
    %63 = vector.broadcast %cst_37 : f32 to vector<8x8xf32>
    %64 = arith.mulf %63, %62 : vector<8x8xf32>
    %65 = vector.extract_strided_slice %3 {offsets = [0, 0], sizes = [8, 8], strides = [1, 1]} : vector<8x12xf32> to vector<8x8xf32>
    %66 = arith.addf %64, %65 : vector<8x8xf32>
    %cst_38 = arith.constant dense<0xFF800000> : vector<8xf32>
    %67 = vector.multi_reduction <maximumf>, %66, %cst_38 [1] : vector<8x8xf32> to vector<8xf32>
    %68 = vector.shape_cast %67 : vector<8xf32> to vector<8x1xf32>
    %69 = vector.broadcast %68 : vector<8x1xf32> to vector<8x8xf32>
    %70 = arith.subf %66, %69 : vector<8x8xf32>
    %71 = math.exp %70 : vector<8x8xf32>
    %cst_39 = arith.constant dense<0.000000e+00> : vector<8xf32>
    %72 = vector.multi_reduction <add>, %71, %cst_39 [1] : vector<8x8xf32> to vector<8xf32>
    %73 = vector.shape_cast %72 : vector<8xf32> to vector<8x1xf32>
    %74 = vector.broadcast %73 : vector<8x1xf32> to vector<8x8xf32>
    %75 = arith.divf %71, %74 : vector<8x8xf32>
    %c0_40 = arith.constant 0 : index
    %c0_41 = arith.constant 0 : index
    %c0_42 = arith.constant 0 : index
    %76 = vector.load %arg8[%c0_40, %c0_41, %c0_42] : memref<1x8x8xf32, #tpu.memory_space<vmem>>, vector<1x8x8xf32>
    %77 = vector.shape_cast %76 : vector<1x8x8xf32> to vector<8x8xf32>
    %78 = vector.shape_cast %75 : vector<8x8xf32> to vector<1x8x8xf32>
    tpu.vector_store %arg8[%c0_40, %c0_41, %c0_42], %78 {strides = array<i32>} : memref<1x8x8xf32, #tpu.memory_space<vmem>>, vector<1x8x8xf32>,
    return
  }
  func.func @transform_0(%arg0: i32) -> (i32, i32, i32) {
    %c0_i32 = arith.constant 0 : i32
    %c0_i32_0 = arith.constant 0 : i32
    %c0_i32_1 = arith.constant 0 : i32
    return %arg0, %c0_i32, %c0_i32_0 : i32, i32, i32
  }
  func.func @transform_1(%arg0: i32) -> (i32, i32, i32, i32) {
    %c0_i32 = arith.constant 0 : i32
    %c0_i32_0 = arith.constant 0 : i32
    %c0_i32_1 = arith.constant 0 : i32
    %c0_i32_2 = arith.constant 0 : i32
    return %arg0, %c0_i32, %c0_i32_0, %c0_i32_1 : i32, i32, i32, i32
  }
  func.func @transform_2(%arg0: i32) -> (i32, i32, i32, i32) {
    %c0_i32 = arith.constant 0 : i32
    %c0_i32_0 = arith.constant 0 : i32
    %c0_i32_1 = arith.constant 0 : i32
    %c0_i32_2 = arith.constant 0 : i32
    return %arg0, %c0_i32, %c0_i32_0, %c0_i32_1 : i32, i32, i32, i32
  }
  func.func @transform_3(%arg0: i32) -> (i32, i32, i32) {
    %c0_i32 = arith.constant 0 : i32
    %c0_i32_0 = arith.constant 0 : i32
    %c0_i32_1 = arith.constant 0 : i32
    return %arg0, %c0_i32, %c0_i32_0 : i32, i32, i32
  }
  func.func @transform_4(%arg0: i32) -> (i32, i32, i32) {
    %c0_i32 = arith.constant 0 : i32
    %c0_i32_0 = arith.constant 0 : i32
    %c0_i32_1 = arith.constant 0 : i32
    return %arg0, %c0_i32, %c0_i32_0 : i32, i32, i32
  }
  func.func @transform_5(%arg0: i32) -> (i32, i32, i32) {
    %c0_i32 = arith.constant 0 : i32
    %c0_i32_0 = arith.constant 0 : i32
    %c0_i32_1 = arith.constant 0 : i32
    %c0_i32_2 = arith.constant 0 : i32
    return %c0_i32, %c0_i32_0, %c0_i32_1 : i32, i32, i32
  }
  func.func @transform_6(%arg0: i32) -> (i32, i32, i32) {
    %c0_i32 = arith.constant 0 : i32
    %c0_i32_0 = arith.constant 0 : i32
    %c0_i32_1 = arith.constant 0 : i32
    %c0_i32_2 = arith.constant 0 : i32
    return %c0_i32, %c0_i32_0, %c0_i32_1 : i32, i32, i32
  }
  func.func @transform_7(%arg0: i32) -> (i32, i32, i32) {
    %c0_i32 = arith.constant 0 : i32
    %c0_i32_0 = arith.constant 0 : i32
    %c0_i32_1 = arith.constant 0 : i32
    return %arg0, %c0_i32, %c0_i32_0 : i32, i32, i32
  }
}

</mosaic_0001>

<bundles_post_ra>
// kernel: tpu_custom_call.1
= control target key start
LH: loop header
LB: loop body
LE: loop exit
PB: predicated region body
PF: predicated region fallthrough
CT: control target
= control target key end

     0   :  { %12 = vsyncpa [#allocation3], 0  ;;  %s2645_s0 = inlined_call_operand.vmem [shape: f32[2,8,33], index: 0, kind: input, shape index: {}]   ;;  %s2646_s1 = inlined_call_operand.vmem [shape: bf16[2,4,12,8], index: 1, kind: input, shape index: {}]   ;;  %s2647_s2 = inlined_call_operand.vmem [shape: bf16[2,4,12,8], index: 2, kind: input, shape index: {}]   ;;  %s2648_s3 = inlined_call_operand.vmem [shape: f32[2,32,8], index: 3, kind: input, shape index: {}]   ;;  %s2649_s4 = inlined_call_operand.vmem [shape: f32[2,8,12], index: 4, kind: input, shape index: {}]   ;;  %s2650_s5 = inlined_call_operand.vmem [shape: f32[4,8,33], index: 5, kind: input, shape index: {}]   ;;  %s2651_s6 = inlined_call_operand.vmem [shape: f32[4,8,32], index: 6, kind: input, shape index: {}]   ;;  %s2652_s7 = inlined_call_operand.hbm [shape: f32[2,8,8], index: 7, kind: output, shape index: {}]  }
   0x1   :  { %14 = vsyncpa [#allocation3 + $0x1], 0  ;;  %s2302_s24 = smov 0   ;;  %s2304_s25 = smov 0  }
   0x2   :  { %s2306_s26 = smov 0   ;;  %s2308_s27 = smov 0  }
   0x3 LB: > { %s2323_s28 = sadd.s32 4294967295, %s2257_s27   ;;  %s1929_s29 = sadd.s32 4294967294, %s2257_s27   ;;  %s2257_s27 = sphi %s2308_s27, %s2658_s27   ;;  %s2253_s26 = sphi %s2306_s26, %s2657_s26   ;;  %s2249_s25 = sphi %s2304_s25, %s2656_s25   ;;  %s2245_s24 = sphi %s2302_s24, %s2655_s24  }
   0x4   : > { %s2327_s30 = sadd.s32 1, %s2257_s27   ;;  %s199_s8 = sadd.s32 1, %s2253_s26 }
   0x5   : > { %s196_s9 = ssub.s32 %s2257_s27, %s2327_s30  ;;  %p209_p0 = scmp.ne.s32.totalorder %s2253_s26, %s2249_s25 }
   0x6   : > { %p197_p1 = scmp.eq.s32.totalorder %s196_s9, 0  ;;  %p210_p2 = scmp.eq.s32.totalorder %s2323_s28, 1 }
   0x7   : > { %p215_p3 = scmp.ne.s32.totalorder %s2249_s25, %s2245_s24  ;;  %p216_p4 = scmp.eq.s32.totalorder %s1929_s29, 1 }
   0x8   : > { %s2338_s10 = scalar_select %p197_p1, %s2253_s26, %s199_s8  }
   0x9   : > { %p2340_p5 = por %p210_p2, %p209_p0  ;;  %p2344_p6 = por %p216_p4, %p215_p3 }
   0xa   : > { %p1932_p7 = scmp.ge.s32.totalorder %s2257_s27, 1  ;;  %p278_p8 = scmp.lt.s32.totalorder %s2257_s27, 3 }
   0xc   : > { %p279_p9 = pnand %p1932_p7, %p278_p8 }
   0xd   : > { %p328_p10 = scmp.lt.s32.totalorder (!%p279_p9), %s2323_s28, 1  ;;  %s2261_s16 = smov (!%p279_p9), [#allocation2]  }
   0xe   : > { %282 = sbr.rel (%p279_p9) target bundleno = 1673 (0x689), region = 48  ;;  %s2201_s20 = sshll.u32 (!%p279_p9), %s2261_s16, 4  ;;  %s2202_s20 = int_to_ptr.vmem [resolvable:$false] %s2201_s20 }
  0x13   : > { %v353_v0 = vld [vmem:[%s2650_s5] sm:$0xff]  ;;  %vm357_vm0 = vcmask 269312   ;;  %v2259_v1 = vmov 0.0   ;;  %vm2260_vm1 = vmmov 0   ;;  %v355_v2 = vld [vmem:[%s2650_s5 + $0x10] sm:$0xff]  ;;  %s2362_s17 = scalar_select %p328_p10, %s2323_s28, 1  ;;  %v1010_v28 = vlaneseq }
  0x14   : > { %2027 = vmatprep.subr.mxu1 %v2259_v1  ;;  %2029 = vmatprep.mubr.msk.f32.mxu1 %vm2260_vm1, %v2259_v1  ;;  %v354_v3 = vld [vmem:[%s2650_s5 + $0x8] sm:$0xff]  ;;  %vm685_vm2 = vcmask 64512   ;;  %v356_v8 = vld [vmem:[%s2650_s5 + $0x18] sm:$0xff]  ;;  %vm1017_vm4 = vcmask 97280   ;;  %vm1109_vm5 = vcmask 1043456   ;;  %vm1707_vm6 = vcmask 261120  }
  0x15   : > { %2028 = vmatpush3.xpose.msk.msra.mxu1 %vm357_vm0, %v353_v0  ;;  %2037 = vmatprep.subr.mxu0 %v2259_v1  ;;  %s1934_s18 = sshll.u32 %s2362_s17, 3  ;;  %s2369_s19 = sshll.u32 %s2362_s17, 5  ;;  %v2446_v29 = vand.u32 127, %v1010_v28 }
  0x16   : > { %2032 = vmatprep.subr.mxu1 %v2259_v1  ;;  %2038 = vmatpush3.xpose.msk.msra.mxu0 %vm357_vm0, %v355_v2  ;;  %s331_s22 = scalar_lea.vmem %s2645_s0, %s1934_s18  ;;  %s2383_s8 = scalar_lea.vmem %s2646_s1, %s2369_s19 }
  0x17   : > { %2039 = vmatprep.mubr.msk.f32.mxu0 %vm2260_vm1, %v2259_v1  ;;  %2047 = vmatprep.subr.mxu0 %v2259_v1  ;;  %v351_v4 = vld [vmem:[%s331_s22] sm:$0xff]  ;;  %v656_v10 = vld [vmem:[%s2383_s8 + $0xc] sm:$0x3]  ;;  %v658_v13 = vld [vmem:[%s2383_s8 + $0x14] sm:$0x3]  ;;  %s350_s21 = scalar_lea.vmem %s2649_s4, %s1934_s18  ;;  %vm1012_vm3 = vcmp.lt.s32.totalorder %v2446_v29, 8  ;;  %s2531_s22 = scalar_lea.vmem %s2647_s2, %s2369_s19 }
  0x18   : > { %v654_v5 = vld [vmem:[%s2383_s8 + $0x4] sm:$0x3]  ;;  %v653_v6 = vld [vmem:[%s2383_s8] ss:$8 sps:$4 sm:$0xff]   ;;  %2030 = vmatmul.mubr.msk.f32.vlgmr.msra.gmra.mxu1 %vm357_vm0, %v351_v4  ;;  %v664_v11 = vunpack.c.l.bf16 %v656_v10  ;;  %v666_v14 = vunpack.c.l.bf16 %v658_v13  ;;  %v657_v15 = vld [vmem:[%s2383_s8 + $0x10] ss:$8 sps:$4 sm:$0xff]   ;;  %s346_s17 = scalar_lea.vmem %s2648_s3, %s2369_s19 }
  0x19   : > { %2040 = vmatmul.mubr.msk.f32.vlgmr.msra.gmra.mxu0 %vm357_vm0, %v351_v4  ;;  %v662_v7 = vunpack.c.l.bf16 %v654_v5  ;;  %2033 = vmatpush3.xpose.msk.msra.mxu1 %vm357_vm0, %v354_v3  ;;  %v661_v9 = vunpack.c.l.bf16 %v653_v6  ;;  %v663_v12 = vunpack.c.h.bf16 %v653_v6  ;;  %v660_v16 = vld [vmem:[%s2383_s8 + $0x1c] sm:$0x3]  ;;  %v665_v20 = vunpack.c.l.bf16 %v657_v15  ;;  %v2448_v30 = vld [vmem:[%s350_s21] sm:$0xff]  ;;  %s325_s19 = sand.u32 1, %s2249_s25  }
  0x1a   : > { %2034 = vmatprep.mubr.msk.f32.mxu1 %vm2260_vm1, %v2259_v1  ;;  %2042 = vmatprep.subr.mxu1 %v2259_v1  ;;  %v668_v21 = vunpack.c.l.bf16 %v660_v16  ;;  %v667_v25 = vunpack.c.h.bf16 %v657_v15  ;;  %s1933_s18 = sshll.u32 %s325_s19, 3  ;;  %s1809_s14 = scalar_lea.sflag [#allocation3], %s325_s19 }
  0x1b   : > { %2048 = vmatpush3.xpose.msk.msra.mxu0 %vm685_vm2, %v662_v7  ;;  %2051 = vmatprep.mubr.msk.f32.mxu0 %vm2260_vm1, %v2259_v1  ;;  %s327_s23 = scalar_lea.vmem [#allocation2], %s1933_s18 }
  0x1c   : > { %2049 = vmatprep.subr.mxu0 %v2259_v1  ;;  %2035 = vmatmul.mubr.msk.f32.vlgmr.msra.gmra.mxu1 %vm357_vm0, %v351_v4  ;;  %s1822_s29 = sshll.u32 %s327_s23, 4  ;;  %s1823_s29 = int_to_ptr.vmem [resolvable:$true] %s1822_s29 }
  0x1d   : > { %2043 = vmatpush3.xpose.msk.msra.mxu1 %vm357_vm0, %v356_v8  ;;  %2044 = vmatprep.mubr.msk.f32.mxu1 %vm2260_vm1, %v2259_v1  ;;  %s2197_s15 = scalar_lea.vmem %s1823_s29, 128  ;;  %p2204_p0 = scmp.lt.s32.totalorder %s1823_s29, %s2202_s20 }
  0x1e   : > { %2054 = vmatprep.subr.mxu1 %v2259_v1  ;;  %p2198_p11 = scmp.ne.s32.totalorder %s1823_s29, %s2197_s15 }
  0x1f   : > { %2050 = vmatpush3.xpose.msk.msra.mxu0 %vm685_vm2, %v661_v9 }
  0x20   : > { %2061 = vmatprep.subr.mxu0 %v2259_v1  ;;  %2045 = vmatmul.mubr.msk.f32.vlgmr.msra.gmra.mxu1 %vm357_vm0, %v351_v4  ;;  %p2199_p12 = pnand %p2198_p11, %p2340_p5 }
  0x21   : > { %2055 = vmatpush3.xpose.msk.msra.mxu1 %vm685_vm2, %v664_v11  ;;  %2058 = vmatprep.mubr.msk.f32.mxu1 %vm2260_vm1, %v2259_v1 }
  0x22   : > { %2056 = vmatprep.subr.mxu1 %v2259_v1  ;;  %p2200_p13 = pneg %p2199_p12 }
  0x25   : > { %2057 = vmatpush3.xpose.msk.msra.mxu1 %vm685_vm2, %v663_v12 }
  0x26   : > { %2068 = vmatprep.subr.mxu1 %v2259_v1 }
  0xd8   : > { %v430_v17 = vpop.f32.mrf.mxu1 }
  0xd9   : > { %v576_v18 = vpop.f32.mrf.mxu0  ;;  %2052 = vmatmul.mubr.msk.f32.vlgmr.msra.gmra.mxu0 %vm685_vm2, %v430_v17 }
  0xda   : > { %v2031_v19 = vpop.f32.mrf.mxu1  ;;  %2062 = vmatpush3.xpose.msk.msra.mxu0 %vm685_vm2, %v666_v14  ;;  %2065 = vmatprep.mubr.msk.f32.mxu0 %vm2260_vm1, %v2259_v1 }
  0xdb   : > { %v2041_v22 = vpop.f32.mrf.mxu0  ;;  %2063 = vmatprep.subr.mxu0 %v2259_v1 }
  0xdc   : > { %v503_v23 = vpop.f32.mrf.mxu1 }
  0xdd   : > { %2059 = vmatmul.mubr.msk.f32.vlgmr.msra.gmra.mxu1 %vm685_vm2, %v503_v23 }
  0xde   : > { %v2036_v24 = vpop.f32.mrf.mxu1  ;;  %2064 = vmatpush3.xpose.msk.msra.mxu0 %vm685_vm2, %v665_v20  ;;  %2069 = vmatpush3.xpose.msk.msra.mxu1 %vm685_vm2, %v668_v21 }
  0xdf   : > { %2070 = vmatprep.subr.mxu1 %v2259_v1  ;;  %2072 = vmatprep.mubr.msk.f32.mxu1 %vm2260_vm1, %v2259_v1 }
  0xe0   : > { %v649_v26 = vpop.f32.mrf.mxu1  ;;  %2075 = vmatprep.subr.mxu0 %v2259_v1 }
  0xe1   : > { %2066 = vmatmul.mubr.msk.f32.vlgmr.msra.gmra.mxu0 %vm685_vm2, %v576_v18 }
  0xe2   : > { %2071 = vmatpush3.xpose.msk.msra.mxu1 %vm685_vm2, %v667_v25  ;;  %v2046_v27 = vpop.f32.mrf.mxu1  ;;  %2079 = vmatprep.mubr.msk.f32.mxu0 %vm2260_vm1, %v2259_v1 }
  0xe3   : > { %2082 = vmatprep.subr.mxu1 %v2259_v1 }
  0xe5   : > { %2073 = vmatmul.mubr.msk.f32.vlgmr.msra.gmra.mxu1 %vm685_vm2, %v649_v26 }
  0xe6   : > { %2086 = vmatprep.mubr.msk.f32.mxu1 %vm2260_vm1, %v2259_v1 }
 0x199   : > { %v761_v31 = vpop.f32.mrf.mxu0 }
 0x19a   : > { %v1002_v32 = vmul.f32 0.35355338, %v761_v31 }
 0x19b   : > { %v2053_v33 = vpop.f32.mrf.mxu0 }
 0x19c   : > { %v1006_v34 = vadd.f32 %v1002_v32, %v2448_v30 }
 0x19d   : > { %v840_v35 = vpop.f32.mrf.mxu1 }
 0x19e   : > { %v1003_v36 = vmul.f32 0.35355338, %v840_v35  ;;  %v1013_v37 = vsel %vm1012_vm3, %v1006_v34, -inf  ;;  %v1030_v41 = vsel %vm1012_vm3, -inf, %v1006_v34 }
 0x19f   : > { %v2060_v38 = vpop.f32.mrf.mxu1  ;;  %v1018_v39 = vsel %vm1017_vm4, %v1013_v37, -inf  ;;  %v1034_v45 = vsel %vm1017_vm4, %v1030_v41, -inf }
 0x1a0   : > { %v1007_v40 = vadd.f32 %v1003_v36, %v2448_v30  ;;  %1019 = vmax.xlane.f32.xlu0 %v1018_v39 }
 0x1a1   : > { %v919_v42 = vpop.f32.mrf.mxu0 }
 0x1a2   : > { %v1004_v43 = vmul.f32 0.35355338, %v919_v42  ;;  %v1014_v44 = vsel %vm1012_vm3, %v1007_v40, -inf  ;;  %v1031_v49 = vsel %vm1012_vm3, -inf, %v1007_v40  ;;  %v670_v42 = vld [vmem:[%s2531_s22 + $0x4] sm:$0x3] }
 0x1a3   : > { %v1021_v46 = vsel %vm1017_vm4, %v1014_v44, -inf  ;;  %v2067_v47 = vpop.f32.mrf.mxu0  ;;  %v1037_v54 = vsel %vm1017_vm4, %v1031_v49, -inf  ;;  %v669_v44 = vld [vmem:[%s2531_s22] ss:$8 sps:$4 sm:$0xff]  }
 0x1a4   : > { %v1008_v48 = vadd.f32 %v1004_v43, %v2448_v30  ;;  %1035 = vmax.xlane.f32.xlu0 %v1034_v45  ;;  %1022 = vmax.xlane.f32.xlu1 %v1021_v46  ;;  %v678_v43 = vunpack.c.l.bf16 %v670_v42  ;;  %v677_v45 = vunpack.c.l.bf16 %v669_v44  ;;  %v672_v46 = vld [vmem:[%s2531_s22 + $0xc] sm:$0x3] }
 0x1a5   : > { %v998_v50 = vpop.f32.mrf.mxu1  ;;  %v680_v47 = vunpack.c.l.bf16 %v672_v46 }
 0x1a6   : > { %v1005_v51 = vmul.f32 0.35355338, %v998_v50  ;;  %v1015_v52 = vsel %vm1012_vm3, %v1008_v48, -inf  ;;  %v1032_v53 = vsel %vm1012_vm3, -inf, %v1008_v48  ;;  %2076 = vmatpush3.msk.msra.mxu0 %vm1109_vm5, %v678_v43 }
 0x1a7   : > { %v2074_v55 = vpop.f32.mrf.mxu1  ;;  %v1024_v56 = vsel %vm1017_vm4, %v1015_v52, -inf  ;;  %v1040_v58 = vsel %vm1017_vm4, %v1032_v53, -inf  ;;  %2077 = vmatprep.subr.mxu0 %v2259_v1  ;;  %2083 = vmatpush3.msk.msra.mxu1 %vm1109_vm5, %v680_v47 }
 0x1a8   : > { %v1009_v57 = vadd.f32 %v1005_v51, %v2448_v30  ;;  %1038 = vmax.xlane.f32.xlu1 %v1037_v54  ;;  %1025 = vmax.xlane.f32.xlu0 %v1024_v56 }
 0x1a9   : > { %2078 = vmatpush3.msra.mxu0 %v677_v45  ;;  %2084 = vmatprep.subr.mxu1 %v2259_v1 }
 0x1aa   : > { %v1033_v59 = vsel %vm1012_vm3, -inf, %v1009_v57  ;;  %v1016_v60 = vsel %vm1012_vm3, %v1009_v57, -inf  ;;  %2089 = vmatprep.subr.mxu0 %v2259_v1 }
 0x1ab   : > { %v1027_v61 = vsel %vm1017_vm4, %v1016_v60, -inf  ;;  %v1043_v62 = vsel %vm1017_vm4, %v1033_v59, -inf  ;;  %v674_v60 = vld [vmem:[%s2531_s22 + $0x14] sm:$0x3] }
 0x1ac   : > { %1041 = vmax.xlane.f32.xlu1 %v1040_v58  ;;  %1028 = vmax.xlane.f32.xlu0 %v1027_v61 }
 0x1b0   : > { %1044 = vmax.xlane.f32.xlu1 %v1043_v62  ;;  %v673_v62 = vld [vmem:[%s2531_s22 + $0x10] ss:$8 sps:$4 sm:$0xff]  }
 0x229   : > { %v1020_v63 = vpop.xlane.xlu0 %1019 }
 0x22d   : > { %v1036_v0 = vpop.xlane.xlu0 %1035  ;;  %v1023_v2 = vpop.xlane.xlu1 %1022 }
 0x22e   : > { %v1046_v3 = vsel %vm1012_vm3, %v1020_v63, %v1036_v0  ;;  %v682_v0 = vunpack.c.l.bf16 %v674_v60 }
 0x22f   : > { %v1050_v4 = vsub.f32 %v1006_v34, %v1046_v3  ;;  %v676_v3 = vld [vmem:[%s2531_s22 + $0x1c] sm:$0x3]  ;;  %s1976_s22 = sshll.u32 %s2323_s28, 7  ;;  %s2203_s28 = scalar_lea.vmem %s2202_s20, 256 }
 0x230   : > { %s1820_s13 = scalar_lea.hbm %s2652_s7, %s1976_s22  ;;  %p2205_p1 = scmp.lt.s32.totalorder %s2203_s28, %s2197_s15 }
 0x231   : > { %v1054_v5 = vmul.f32 1.442695, %v1050_v4  ;;  %v1039_v6 = vpop.xlane.xlu1 %1038  ;;  %v1026_v7 = vpop.xlane.xlu0 %1025  ;;  %v681_v4 = vunpack.c.l.bf16 %v673_v62 }
 0x232   : > { %v1047_v8 = vsel %vm1012_vm3, %v1023_v2, %v1039_v6  ;;  %v684_v6 = vunpack.c.l.bf16 %v676_v3  ;;  %p2206_p2 = por %p2205_p1, %p2204_p0 }
 0x233   : > { %2175 = vpow2.f32 %v1054_v5  ;;  %v1051_v9 = vsub.f32 %v1007_v40, %v1047_v8 }
 0x234   : > { %p2207_p3 = pnand %p2206_p2, %p2200_p13 }
 0x235   : > { %v1056_v10 = vmul.f32 1.442695, %v1051_v9  ;;  %v1042_v11 = vpop.xlane.xlu1 %1041  ;;  %v1029_v14 = vpop.xlane.xlu0 %1028 }
 0x236   : > { %v1048_v12 = vsel %vm1012_vm3, %v1026_v7, %v1042_v11  ;;  %v683_v7 = vunpack.c.h.bf16 %v673_v62 }
 0x237   : > { %2177 = vpow2.f32 %v1056_v10  ;;  %v1052_v13 = vsub.f32 %v1008_v48, %v1048_v12  ;;  %v679_v48 = vunpack.c.h.bf16 %v669_v44  ;;  %v1411_v12 = vld [vmem:[%s2651_s6] sm:$0xff] }
 0x239   : > { %v1058_v15 = vmul.f32 1.442695, %v1052_v13  ;;  %v1045_v16 = vpop.xlane.xlu1 %1044  ;;  %2085 = vmatpush3.msra.mxu1 %v679_v48  ;;  %v1412_v13 = vld [vmem:[%s2651_s6 + $0x8] sm:$0xff] }
 0x23a   : > { %v1049_v17 = vsel %vm1012_vm3, %v1029_v14, %v1045_v16  ;;  %2096 = vmatprep.subr.mxu1 %v2259_v1  ;;  %v1413_v14 = vld [vmem:[%s2651_s6 + $0x10] sm:$0xff] }
 0x23b   : > { %2179 = vpow2.f32 %v1058_v15  ;;  %v1053_v18 = vsub.f32 %v1009_v57, %v1049_v17  ;;  %v1414_v17 = vld [vmem:[%s2651_s6 + $0x18] sm:$0xff] }
 0x23d   : > { %v1060_v19 = vmul.f32 1.442695, %v1053_v18 }
 0x23f   : > { %2181 = vpow2.f32 %v1060_v19 }
 0x240   : > { %v2487_v20 = vpop.eup %2175 }
 0x241   : > { %v1078_v21 = vsel %vm1012_vm3, 0.0, %v2487_v20  ;;  %v1062_v22 = vsel %vm1012_vm3, %v2487_v20, 0.0 }
 0x242   : > { %v1082_v23 = vsel %vm1017_vm4, %v1078_v21, 0.0  ;;  %v1066_v24 = vsel %vm1017_vm4, %v1062_v22, 0.0 }
 0x243   : > { %1083 = vadd.xlane.f32.xlu1 %v1082_v23  ;;  %1067 = vadd.xlane.f32.xlu0 %v1066_v24  ;;  %v1718_v24 = vld [vmem:[%s346_s17 + $0x18] sm:$0xff] }
 0x244   : > { %v2497_v25 = vpop.eup %2177 }
 0x245   : > { %v1079_v26 = vsel %vm1012_vm3, 0.0, %v2497_v25  ;;  %v1063_v27 = vsel %vm1012_vm3, %v2497_v25, 0.0 }
 0x246   : > { %v1085_v28 = vsel %vm1017_vm4, %v1079_v26, 0.0  ;;  %v1069_v31 = vsel %vm1017_vm4, %v1063_v27, 0.0  ;;  %v1716_v26 = vld [vmem:[%s346_s17 + $0x8] sm:$0xff]  ;;  %v1715_v27 = vld [vmem:[%s346_s17] sm:$0xff] }
 0x247   : > { %1086 = vadd.xlane.f32.xlu1 %v1085_v28  ;;  %1070 = vadd.xlane.f32.xlu0 %v1069_v31 }
 0x248   : > { %v2507_v32 = vpop.eup %2179 }
 0x249   : > { %v1080_v33 = vsel %vm1012_vm3, 0.0, %v2507_v32  ;;  %v1064_v34 = vsel %vm1012_vm3, %v2507_v32, 0.0 }
 0x24a   : > { %v1088_v35 = vsel %vm1017_vm4, %v1080_v33, 0.0  ;;  %v1072_v36 = vsel %vm1017_vm4, %v1064_v34, 0.0 }
 0x24b   : > { %1089 = vadd.xlane.f32.xlu1 %v1088_v35  ;;  %1073 = vadd.xlane.f32.xlu0 %v1072_v36 }
 0x24c   : > { %v2517_v37 = vpop.eup %2181 }
 0x24d   : > { %v1081_v38 = vsel %vm1012_vm3, 0.0, %v2517_v37  ;;  %v1065_v39 = vsel %vm1012_vm3, %v2517_v37, 0.0 }
 0x24e   : > { %v1091_v40 = vsel %vm1017_vm4, %v1081_v38, 0.0  ;;  %v1075_v41 = vsel %vm1017_vm4, %v1065_v39, 0.0 }
 0x24f   : > { %1092 = vadd.xlane.f32.xlu1 %v1091_v40  ;;  %1076 = vadd.xlane.f32.xlu0 %v1075_v41 }
 0x2cc   : > { %v1084_v49 = vpop.xlane.xlu1 %1083  ;;  %v1068_v50 = vpop.xlane.xlu0 %1067 }
 0x2cd   : > { %v1094_v51 = vsel %vm1012_vm3, %v1068_v50, %v1084_v49 }
 0x2ce   : > { %2183 = vrcp.f32 %v1094_v51 }
 0x2d0   : > { %v1087_v52 = vpop.xlane.xlu1 %1086  ;;  %v1071_v53 = vpop.xlane.xlu0 %1070 }
 0x2d1   : > { %v1095_v54 = vsel %vm1012_vm3, %v1071_v53, %v1087_v52 }
 0x2d2   : > { %2185 = vrcp.f32 %v1095_v54 }
 0x2d4   : > { %v1090_v55 = vpop.xlane.xlu1 %1089  ;;  %v1074_v56 = vpop.xlane.xlu0 %1073 }
 0x2d5   : > { %v1096_v57 = vsel %vm1012_vm3, %v1074_v56, %v1090_v55 }
 0x2d6   : > { %2187 = vrcp.f32 %v1096_v57 }
 0x2d8   : > { %v1093_v58 = vpop.xlane.xlu1 %1092  ;;  %v1077_v59 = vpop.xlane.xlu0 %1076 }
 0x2d9   : > { %v1097_v61 = vsel %vm1012_vm3, %v1077_v59, %v1093_v58 }
 0x2da   : > { %2189 = vrcp.f32 %v1097_v61 }
 0x2db   : > { %v2184_v63 = vpop.eup %2183 }
 0x2dc   : > { %v1099_v2 = vmul.f32 %v2184_v63, %v2487_v20 }
 0x2de   : > { %2080 = vmatmul.mubr.msk.f32.vlgmr.msra.gmra.mxu0 %vm1017_vm4, %v1099_v2 }
 0x2df   : > { %v2186_v5 = vpop.eup %2185  ;;  %2090 = vmatpush3.msk.msra.mxu0 %vm1109_vm5, %v682_v0  ;;  %2093 = vmatprep.mubr.msk.f32.mxu0 %vm2260_vm1, %v2259_v1 }
 0x2e0   : > { %v1101_v29 = vmul.f32 %v2186_v5, %v2497_v25  ;;  %2091 = vmatprep.subr.mxu0 %v2259_v1  ;;  %v1717_v25 = vld [vmem:[%s346_s17 + $0x10] sm:$0xff] }
 0x2e1   : > { %2092 = vmatpush3.msra.mxu0 %v681_v4 }
 0x2e2   : > { %2087 = vmatmul.mubr.msk.f32.vlgmr.msra.gmra.mxu1 %vm1017_vm4, %v1101_v29  ;;  %2103 = vmatprep.subr.mxu0 %v2259_v1 }
 0x2e3   : > { %v2188_v8 = vpop.eup %2187  ;;  %2097 = vmatpush3.msk.msra.mxu1 %vm1109_vm5, %v684_v6  ;;  %2100 = vmatprep.mubr.msk.f32.mxu1 %vm2260_vm1, %v2259_v1 }
 0x2e4   : > { %v1103_v9 = vmul.f32 %v2188_v8, %v2507_v32  ;;  %2098 = vmatprep.subr.mxu1 %v2259_v1 }
 0x2e5   : > { %2099 = vmatpush3.msra.mxu1 %v683_v7 }
 0x2e6   : > { %2094 = vmatmul.mubr.msk.f32.vlgmr.msra.gmra.mxu0 %vm1017_vm4, %v1103_v9  ;;  %2108 = vmatprep.subr.mxu1 %v2259_v1 }
 0x2e7   : > { %v2190_v10 = vpop.eup %2189  ;;  %2105 = vmatprep.mubr.msk.f32.mxu0 %vm2260_vm1, %v2259_v1  ;;  %2104 = vmatpush3.msra.mxu0 %v1411_v12 }
 0x2e8   : > { %v1105_v11 = vmul.f32 %v2190_v10, %v2517_v37  ;;  %2113 = vmatprep.subr.mxu0 %v2259_v1 }
 0x2ea   : > { %2101 = vmatmul.mubr.msk.f32.vlgmr.msra.gmra.mxu1 %vm1017_vm4, %v1105_v11 }
 0x2eb   : > { %2110 = vmatprep.mubr.msk.f32.mxu1 %vm2260_vm1, %v2259_v1  ;;  %2109 = vmatpush3.msra.mxu1 %v1412_v13 }
 0x2ec   : > { %2118 = vmatprep.subr.mxu1 %v2259_v1 }
 0x39e   : > { %v1179_v15 = vpop.f32.mrf.mxu0 }
 0x39f   : > { %2106 = vmatmul.mubr.msk.f32.vlgmr.msra.gmra.mxu0 %vm685_vm2, %v1179_v15 }
 0x3a0   : > { %v2081_v16 = vpop.f32.mrf.mxu0  ;;  %2114 = vmatpush3.msra.mxu0 %v1413_v14  ;;  %2115 = vmatprep.mubr.msk.f32.mxu0 %vm2260_vm1, %v2259_v1 }
 0x3a1   : > { %2123 = vmatprep.subr.mxu0 %v2259_v1 }
 0x3a2   : > { %v1255_v18 = vpop.f32.mrf.mxu1 }
 0x3a3   : > { %2111 = vmatmul.mubr.msk.f32.vlgmr.msra.gmra.mxu1 %vm685_vm2, %v1255_v18 }
 0x3a4   : > { %v2088_v19 = vpop.f32.mrf.mxu1  ;;  %2119 = vmatpush3.msra.mxu1 %v1414_v17  ;;  %2120 = vmatprep.mubr.msk.f32.mxu1 %vm2260_vm1, %v2259_v1 }
 0x3a6   : > { %v1331_v20 = vpop.f32.mrf.mxu0 }
 0x3a7   : > { %2116 = vmatmul.mubr.msk.f32.vlgmr.msra.gmra.mxu0 %vm685_vm2, %v1331_v20 }
 0x3a8   : > { %v2095_v21 = vpop.f32.mrf.mxu0  ;;  %2131 = vmatprep.mubr.msk.f32.mxu0 %vm2260_vm1, %v2259_v1  ;;  %2124 = vmatpush3.msra.mxu0 %v1718_v24 }
 0x3a9   : > { %2125 = vmatprep.subr.mxu0 %v2259_v1 }
 0x3aa   : > { %v1407_v22 = vpop.f32.mrf.mxu1  ;;  %2126 = vmatpush3.msra.mxu0 %v1717_v25 }
 0x3ab   : > { %2121 = vmatmul.mubr.msk.f32.vlgmr.msra.gmra.mxu1 %vm685_vm2, %v1407_v22  ;;  %2127 = vmatprep.subr.mxu0 %v2259_v1 }
 0x3ac   : > { %v2102_v23 = vpop.f32.mrf.mxu1  ;;  %2128 = vmatpush3.msra.mxu0 %v1716_v26 }
 0x3ad   : > { %2129 = vmatprep.subr.mxu0 %v2259_v1 }
 0x3ae   : > { %2130 = vmatpush3.msra.mxu0 %v1715_v27 }
 0x45f   : > { %v1484_v28 = vpop.f32.mrf.mxu0 }
 0x460   : > { %v1708_v36 = vsel %vm1707_vm6, %v1484_v28, 0.0 }
 0x461   : > { %v2107_v31 = vpop.f32.mrf.mxu0 }
 0x463   : > { %v1557_v32 = vpop.f32.mrf.mxu1 }
 0x464   : > { %v1709_v34 = vsel %vm1707_vm6, %v1557_v32, 0.0 }
 0x465   : > { %v2112_v33 = vpop.f32.mrf.mxu1  ;;  %v1710_v38 = vadd.f32 %v1709_v34, %v1708_v36 }
 0x467   : > { %v1630_v35 = vpop.f32.mrf.mxu0 }
 0x468   : > { %v1711_v37 = vsel %vm1707_vm6, %v1630_v35, 0.0 }
 0x469   : > { %v2117_v39 = vpop.f32.mrf.mxu0  ;;  %v1712_v40 = vadd.f32 %v1711_v37, %v1710_v38 }
 0x46b   : > { %v1703_v41 = vpop.f32.mrf.mxu1 }
 0x46c   : > { %v1713_v42 = vsel %vm1707_vm6, %v1703_v41, 0.0 }
 0x46d   : > { %v1714_v43 = vadd.f32 %v1713_v42, %v1712_v40  ;;  %v2122_v44 = vpop.f32.mrf.mxu1 }
 0x46f   : > { %2132 = vmatmul.mubr.msk.f32.vlgmr.msra.gmra.mxu0 %vm1707_vm6, %v1714_v43 }
 0x52f   : > { %v1788_v1 = vpop.f32.mrf.mxu0 }
 0x530   : > { %v1792_v45 = vmul.f32 0.17677669, %v1788_v1 }
 0x531   : > { %v2133_v46 = vpop.f32.mrf.mxu0 }
 0x532   : > { %2191 = vtanh.f32 %v1792_v45 }
 0x53f   : > { %v2192_v47 = vpop.eup %2191 }
 0x540   : > { %v1794_v48 = vmul.f32 10.0, %v2192_v47 }
 0x542   : > { %v1795_v49 = vadd.f32 %v1794_v48, %v2448_v30 }
 0x544   : > { %v1796_v50 = vsel %vm685_vm2, %v1795_v49, -inf }
 0x545   : > { %1797 = vmax.xlane.f32.xlu0 %v1796_v50 }
 0x5ce   : > { %v1798_v51 = vpop.xlane.xlu0 %1797 }
 0x5cf   : > { %v1799_v52 = vsub.f32 %v1795_v49, %v1798_v51 }
 0x5d1   : > { %v1800_v53 = vmul.f32 1.442695, %v1799_v52 }
 0x5d3   : > { %2193 = vpow2.f32 %v1800_v53 }
 0x5e0   : > { %v2194_v54 = vpop.eup %2193 }
 0x5e1   : > { %v1802_v55 = vsel %vm685_vm2, %v2194_v54, 0.0 }
 0x5e2   : > { %1803 = vadd.xlane.f32.xlu1 %v1802_v55 }
 0x66b   : > { %v1804_v56 = vpop.xlane.xlu1 %1803 }
 0x66c   : > { %2195 = vrcp.f32 %v1804_v56 }
 0x679   : > { %v2196_v30 = vpop.eup %2195 }
 0x67a   : > { %v1806_v57 = vmul.f32 %v2196_v30, %v2194_v54 }
 0x67c   : > { %1807 = vst.msk [vmem:[%s327_s23] sm:$0xff] %vm685_vm2, %v1806_v57 }
 0x67d   : > { %2210 = shalt.err (!%p2207_p3)
}
 0x67e   : > { %s2211_s21 = scalar_lea.hbm %s1820_s13, 128  ;;  %s2215_s18 = scalar_lea.hbm %s2652_s7, 256 }
 0x67f   : > { %p2212_p4 = scmp.ne.s32.totalorder %s1820_s13, %s2211_s21  ;;  %p2216_p9 = scmp.lt.s32.totalorder %s1820_s13, %s2652_s7 }
 0x680   : > { %p2217_p10 = scmp.lt.s32.totalorder %s2215_s18, %s2211_s21 }
 0x681   : > { %p2213_p7 = pnand %p2212_p4, %p2340_p5 }
 0x682   : > { %p2218_p11 = por %p2217_p10, %p2216_p9 }
 0x683   : > { %p2214_p8 = pneg %p2213_p7 }
 0x685   : > { %p2219_p12 = pnand %p2218_p11, %p2214_p8 }
 0x687   : > { %2222 = shalt.err (!%p2219_p12)
}
 0x688   : > { %2134 = dma.vmem_to_hbm [thread:$0]  (%p2340_p5), %s1823_s29, 128, %s1820_s13, %s1809_s14  }
 0x689 PF: > { %p2140_p13 = scmp.ge.s32.totalorder %s2257_s27, 2  ;;  %s1834_s8 = sand.u32 1, %s2245_s24  }
 0x68a   : > { %s1835_s9 = scalar_lea.sflag [#allocation3], %s1834_s8 }
 0x68b   : > { %p2137_p0 = pnand %p2140_p13, %p2344_p6 }
 0x68d   : > { %p2138_p1 = pneg %p2137_p0 }
 0x68f   : > { %2240 = dma.done.wait (%p2138_p1), %s1835_s9, 128  }
 0x690   : > { %2242 = vsyncadd (%p2138_p1), %s1835_s9, 4294967168  ;;  %p17_p2 = scmp.ge.s32.totalorder %s2327_s30, 4   ;;  %s2655_s24 = smov %s2249_s25 }
 0x691   : > { %s2656_s25 = smov %s2253_s26  ;;  %s2657_s26 = smov %s2338_s10 }
 0x692   : > { %s2658_s27 = smov %s2327_s30  ;;  %19 = sbr.rel (!%p17_p2) target bundleno = 3 (0x3), region = 95 }
 0x697   :  { %1840 = vsyncpa [#allocation3], 1 }
 0x698   :  { %1842 = vsyncpa [#allocation3 + $0x1], 1 }

</bundles_post_ra>
